<compile_context>
chip_gen: v5e
topology: v5e:2x2
jax: 0.10.0
libtpu: 0.0.40
codegen_flags: <defaults>
</compile_context>

<pallas_src>
import functools

import numpy as np
import jax
import jax.numpy as jnp
from jax import lax
from jax.experimental import pallas as pl
from jax.experimental.pallas import tpu as pltpu


# ---------------------------------------------------------------------------
# Sub-pixel (stride-phase) decomposition of ConvTranspose2d along one axis.
# For output phase r in [0, s):
#     y[q*s + r] = sum_t x[q + d[r] - t] * W[m[r] + t*s]
# pad_lo is the left zero padding of x so every accessed padded index is >= 0,
# and U = pad_lo + max(d) + 1 is the per-output-block input window size.
# ---------------------------------------------------------------------------
def _phase_params(k, s, p):
    m = [(r + p) % s for r in range(s)]
    d = [(r + p) // s for r in range(s)]
    t = [(-(-(k - m[r]) // s) if m[r] < k else 0) for r in range(s)]
    pad_lo = max([0] + [t[r] - 1 - d[r] for r in range(s)])
    u = pad_lo + max(d) + 1
    return m, d, t, pad_lo, u


# ---------------------------------------------------------------------------
# Kernels
# ---------------------------------------------------------------------------
def _convt_banded_kernel(x_ref, w_ref, b_ref, o_ref, *, u, tq):
    """Small-Cin path: lane-dense banded matmul.

    x_ref: (1, 1, TR, Wp*Cin)         bf16, Cin folded into lanes
    w_ref: (U, Wp*Cin, Qw*s*s*Cout)   bf16 banded weight (grid-invariant)
    b_ref: (1, Qw*s*s*Cout)           f32 bias tiled per (qw, rh, rw)
    o_ref: (1, 1, TQ, Qw*s*s*Cout)    f32 phase-packed output tile
    """
    acc = jnp.dot(x_ref[0, 0, 0:tq, :], w_ref[0],
                  preferred_element_type=jnp.float32)
    for a in range(1, u):
        acc = acc + jnp.dot(x_ref[0, 0, a:a + tq, :], w_ref[a],
                            preferred_element_type=jnp.float32)
    acc = jnp.maximum(acc + b_ref[...], 0.0)        # f32 bias + ReLU epilogue
    o_ref[0, 0] = acc.astype(o_ref.dtype)           # single lane-dense store


def _convt_tap_kernel(x_ref, w_ref, b_ref, o_ref, *, u, tq, qw):
    """Large-Cin path: U*U accumulating dots of contraction Cin (no im2col).

    x_ref: (1, 1, TR, Wp, Cin)    bf16 (Cin already lane-dense)
    w_ref: (U, U, Cin, s*s*Cout)  bf16 fused per-phase weight (grid-invariant)
    b_ref: (1, s*s*Cout)          f32
    o_ref: (1, 1, TQ*Qw, s*s*Cout)
    """
    cin = x_ref.shape[-1]
    rows = tq * qw
    acc = None
    for a in range(u):
        for b in range(u):
            lhs = x_ref[0, 0, a:a + tq, b:b + qw, :].reshape(rows, cin)
            d = jnp.dot(lhs, w_ref[a, b], preferred_element_type=jnp.float32)
            acc = d if acc is None else acc + d
    acc = jnp.maximum(acc + b_ref[...], 0.0)
    o_ref[0, 0] = acc.astype(o_ref.dtype)


# ---------------------------------------------------------------------------
# Plan construction (once per layer / input size): weight packing + tiling.
# ---------------------------------------------------------------------------
def build_convt_plan(weight, bias, *, stride, padding, h, w):
    w_np = np.asarray(jax.device_get(weight), np.float32)   # (Cin, Cout, K, K)
    b_np = np.asarray(jax.device_get(bias), np.float32)     # (Cout,)
    cin, cout, k, k2 = w_np.shape
    assert k == k2, "square kernels only"
    s, p = int(stride), int(padding)
    hout = (h - 1) * s - 2 * p + k
    wout = (w - 1) * s - 2 * p + k
    assert hout > 0 and wout > 0

    m_r, d_r, t_r, pad_lo, u = _phase_params(k, s, p)
    qh = -(-hout // s)
    qw = -(-wout // s)
    s2c = s * s * cout
    wp = max(qw + u - 1, pad_lo + w)

    # Fused per-phase weight wf[a, b, c, rh, rw, co] (numpy -- no traced scatters).
    wf = np.zeros((u, u, cin, s, s, cout), np.float32)
    for rh in range(s):
        for th in range(t_r[rh]):
            kh = m_r[rh] + th * s
            a = pad_lo + d_r[rh] - th
            for rw in range(s):
                for tw in range(t_r[rw]):
                    kw_ = m_r[rw] + tw * s
                    b = pad_lo + d_r[rw] - tw
                    wf[a, b, :, rh, rw, :] = w_np[:, :, kh, kw_]

    wband_bytes = u * (wp * cin) * (qw * s2c) * 2
    use_banded = (cin < 128) and (wband_bytes <= 8 * 2 ** 20)

    # ---- VMEM budget and row-tile (TQ) selection ----
    try:
        vmem_cap = int(pltpu.get_tpu_info().vmem_capacity_bytes)
    except Exception:
        vmem_cap = 64 * 1024 * 1024      # assume the smallest (v7x per-TC VMEM)
    budget = int(vmem_cap * 0.6)         # headroom for double buffering

    def tile_need(tq_):
        tr_ = tq_ + u - 1
        if use_banded:
            return (2 * tr_ * wp * cin * 2              # input tile x2, bf16
                    + 2 * tq_ * qw * s2c * 4            # output tile x2, f32
                    + 2 * u * wp * cin * qw * s2c * 2   # banded weight x2, bf16
                    + 2 * qw * s2c * 4)
        return (2 * tr_ * wp * cin * 2
                + 2 * tq_ * qw * s2c * 4
                + 2 * u * u * cin * s2c * 2
                + 2 * s2c * 4)

    # target MXU M ~ 256..512 rows (v6e/v7x MXU is 256 wide), VMEM capped.
    tq = min(qh, 256) if use_banded else min(qh, max(1, -(-512 // qw)))
    while tq > 1 and tile_need(tq) > budget:
        tq = max(1, tq // 2)
    n_th = -(-qh // tq)
    qh_pad = n_th * tq
    tr = tq + u - 1
    hp = max(qh_pad + u - 1, pad_lo + h)
    vmem_limit = int(min(max(32 * 2 ** 20, 2 * tile_need(tq)),
                         max(32 * 2 ** 20, vmem_cap - 8 * 2 ** 20)))

    if use_banded:
        # Banded weight: contraction lanes (w_in, c), output lanes (q_w, rh, rw, co).
        wband = np.zeros((u, wp * cin, qw * s2c), np.float32)
        wf_r = wf.reshape(u, u, cin, s2c)
        for qwi in range(qw):
            for b in range(u):
                wi = qwi + b
                wband[:, wi * cin:(wi + 1) * cin,
                      qwi * s2c:(qwi + 1) * s2c] = wf_r[:, b]
        w_dev = jnp.asarray(wband, jnp.bfloat16)
        b_dev = jnp.asarray(np.tile(b_np, qw * s * s)[None, :], jnp.float32)
    else:
        w_dev = jnp.asarray(wf.reshape(u, u, cin, s2c), jnp.bfloat16)
        b_dev = jnp.asarray(np.tile(b_np, s * s)[None, :], jnp.float32)

    return dict(cin=cin, cout=cout, k=k, s=s, p=p, h=h, w=w,
                hout=hout, wout=wout, qh=qh, qw=qw, s2c=s2c,
                pad_lo=pad_lo, u=u, wp=wp, hp=hp,
                tq=tq, tr=tr, n_th=n_th, qh_pad=qh_pad,
                use_banded=use_banded, vmem_limit=vmem_limit,
                w_dev=w_dev, b_dev=b_dev)


# ---------------------------------------------------------------------------
# Per-call forward: relu(conv_transpose2d(x, W, b)) for a prepacked plan.
# ---------------------------------------------------------------------------
def convt_apply(plan, x_nchw):
    n, cin, h, w = x_nchw.shape
    assert cin == plan['cin'] and h == plan['h'] and w == plan['w']
    s, s2c = plan['s'], plan['s2c']
    u, tq, tr, n_th = plan['u'], plan['tq'], plan['tr'], plan['n_th']
    qw, qh_pad = plan['qw'], plan['qh_pad']
    pad_lo, hp, wp = plan['pad_lo'], plan['hp'], plan['wp']
    cout, hout, wout = plan['cout'], plan['hout'], plan['wout']

    # NHWC, bf16 (MXU-native), zero-padded to the phase window.
    x = jnp.transpose(x_nchw, (0, 2, 3, 1)).astype(jnp.bfloat16)
    x = jnp.pad(x, ((0, 0), (pad_lo, hp - pad_lo - h),
                    (pad_lo, wp - pad_lo - w), (0, 0)))

    # Row tiles with a (U-1)-row halo.
    # TODO(synk): for very tall inputs replace this gather with an in-kernel
    # manual DMA (memory_space=pl.ANY) to avoid the ~(TR/TQ)x duplicated HBM
    # copy; with TQ >= 128 the duplication is <3%, so the simple form is kept.
    if plan['use_banded']:
        x = x.reshape(n, hp, wp * cin)                   # fold Cin into lanes
        if n_th == 1:
            x_tiles = x[:, :tr][:, None]                 # (N, 1, TR, Wp*Cin)
        else:
            ridx = (np.arange(n_th)[:, None] * tq
                    + np.arange(tr)[None, :]).astype(np.int32)
            x_tiles = x[:, ridx]                         # (N, n_th, TR, Wp*Cin)

        kernel = functools.partial(_convt_banded_kernel, u=u, tq=tq)
        y = pl.pallas_call(
            kernel,
            out_shape=jax.ShapeDtypeStruct((n, n_th, tq, qw * s2c), jnp.float32),
            grid_spec=pltpu.PrefetchScalarGridSpec(
                num_scalar_prefetch=0,
                grid=(n, n_th),
                in_specs=[
                    pl.BlockSpec((1, 1, tr, wp * cin), lambda i, t: (i, t, 0, 0)),
                    # TODO(synk): single-buffer the two invariant operands below
                    # (pipeline_mode=pl.Buffered(1)) to save a weight-copy of VMEM.
                    pl.BlockSpec((u, wp * cin, qw * s2c), lambda i, t: (0, 0, 0)),
                    pl.BlockSpec((1, qw * s2c), lambda i, t: (0, 0)),
                ],
                out_specs=pl.BlockSpec((1, 1, tq, qw * s2c),
                                       lambda i, t: (i, t, 0, 0)),
            ),
            compiler_params=pltpu.CompilerParams(
                dimension_semantics=("parallel", "parallel"),
                vmem_limit_bytes=plan['vmem_limit']),
        )(x_tiles, plan['w_dev'], plan['b_dev'])
    else:
        if n_th == 1:
            x_tiles = x[:, :tr][:, None]                 # (N, 1, TR, Wp, Cin)
        else:
            ridx = (np.arange(n_th)[:, None] * tq
                    + np.arange(tr)[None, :]).astype(np.int32)
            x_tiles = x[:, ridx]

        kernel = functools.partial(_convt_tap_kernel, u=u, tq=tq, qw=qw)
        y = pl.pallas_call(
            kernel,
            out_shape=jax.ShapeDtypeStruct((n, n_th, tq * qw, s2c), jnp.float32),
            grid_spec=pltpu.PrefetchScalarGridSpec(
                num_scalar_prefetch=0,
                grid=(n, n_th),
                in_specs=[
                    pl.BlockSpec((1, 1, tr, wp, cin),
                                 lambda i, t: (i, t, 0, 0, 0)),
                    pl.BlockSpec((u, u, cin, s2c), lambda i, t: (0, 0, 0, 0)),
                    pl.BlockSpec((1, s2c), lambda i, t: (0, 0)),
                ],
                out_specs=pl.BlockSpec((1, 1, tq * qw, s2c),
                                       lambda i, t: (i, t, 0, 0)),
            ),
            compiler_params=pltpu.CompilerParams(
                dimension_semantics=("parallel", "parallel"),
                vmem_limit_bytes=plan['vmem_limit']),
        )(x_tiles, plan['w_dev'], plan['b_dev'])

    # Cheap wrapper glue: depth-to-space, crop overshoot, back to NCHW.
    y = y.reshape(n, qh_pad, qw, s, s, cout)
    y = jnp.transpose(y, (0, 1, 3, 2, 4, 5)).reshape(n, qh_pad * s, qw * s, cout)
    y = y[:, :hout, :wout, :]
    return jnp.transpose(y, (0, 3, 1, 2)).astype(x_nchw.dtype)


def conv_transpose2d_block(x_nchw, weight, bias, *, stride, padding):
    """One-shot convenience wrapper (== module forward with default config)."""
    _, _, h, w = x_nchw.shape
    plan = build_convt_plan(weight, bias, stride=stride, padding=padding, h=h, w=w)
    return convt_apply(plan, x_nchw)


# ---------------------------------------------------------------------------
# Pure-JAX reference
# ---------------------------------------------------------------------------
def _reference(x, weight, bias, k, s, p):
    # ConvTranspose2d == dilated conv with a spatially flipped kernel.
    wf_ref = jnp.transpose(weight[:, :, ::-1, ::-1], (2, 3, 0, 1))
    ref = lax.conv_general_dilated(
        jnp.transpose(x, (0, 2, 3, 1)), wf_ref,
        window_strides=(1, 1),
        padding=[(k - 1 - p, k - 1 - p)] * 2,
        lhs_dilation=(s, s),
        dimension_numbers=("NHWC", "HWIO", "NHWC"),
        precision=lax.Precision.HIGHEST)
    ref = jnp.maximum(ref + bias[None, None, None, :], 0.0)
    return jnp.transpose(ref, (0, 3, 1, 2))


if __name__ == "__main__":
    key = jax.random.PRNGKey(0)

    def run_case(n, cin, cout, h, w, k, s, p, case_key):
        kx, kw_, kb = jax.random.split(case_key, 3)
        # bf16-representable inputs so the kernel's bf16 MXU path is lossless
        # vs the f32 reference (the kernel accumulates in f32).
        x = jax.random.normal(kx, (n, cin, h, w), jnp.float32)
        x = x.astype(jnp.bfloat16).astype(jnp.float32)
        fan = cin * k * k
        weight = jax.random.normal(kw_, (cin, cout, k, k), jnp.float32) / fan ** 0.5
        weight = weight.astype(jnp.bfloat16).astype(jnp.float32)
        bias = jax.random.normal(kb, (cout,), jnp.float32) * 0.1

        plan = build_convt_plan(weight, bias, stride=s, padding=p, h=h, w=w)
        out = jax.block_until_ready(convt_apply(plan, x))

        ref = _reference(x, weight, bias, k, s, p)
        hout = (h - 1) * s - 2 * p + k
        wout = (w - 1) * s - 2 * p + k
        assert out.shape == (n, cout, hout, wout), out.shape
        err = float(jnp.max(jnp.abs(out - ref)))
        assert err < 2e-3, (err, (n, cin, cout, h, w, k, s, p))

    k0, k1, k2, k3 = jax.random.split(key, 4)
    # Typical 2x-upsampling block for this module: K=4, stride=2, padding=1.
    run_case(2, 4, 8, 16, 16, 4, 2, 1, k0)
    # Exact 2x upsample (K == stride, no tap overlap).
    run_case(2, 4, 8, 16, 16, 2, 2, 0, k1)
    # Stride-1 "same-size" transposed conv.
    run_case(2, 4, 8, 16, 16, 3, 1, 1, k2)
    # Wide-channel input exercises the per-tap (Cin >= 128) MXU path.
    run_case(2, 128, 16, 8, 8, 4, 2, 1, k3)

    print("KERNEL_OK")
</pallas_src>

<mosaic_0001>
module attributes {stable_mosaic.version = 11 : i64} {
  func.func @_convt_banded_kernel(%arg0: i32, %arg1: i32, %arg2: memref<1x1x18x72xbf16, #tpu.memory_space<vmem>>, %arg3: memref<3x72x512xbf16, #tpu.memory_space<vmem>>, %arg4: memref<1x512xf32, #tpu.memory_space<vmem>>, %arg5: memref<1x1x16x512xf32, #tpu.memory_space<vmem>>) attributes {dimension_semantics = [#tpu.dimension_semantics<parallel>, #tpu.dimension_semantics<parallel>], iteration_bounds = array<i64: 2, 1>, scalar_prefetch = 0 : i64, scratch_operands = 0 : i64, tpu.core_type = #tpu.core_type<tc>, window_params = [{transform_indices = @transform_0, window_bounds = array<i64: 1, 1, 18, 72>}, {pipeline_mode = #tpu.pipeline_mode<synchronous>, transform_indices = @transform_1, window_bounds = array<i64: 3, 72, 512>}, {pipeline_mode = #tpu.pipeline_mode<synchronous>, transform_indices = @transform_2, window_bounds = array<i64: 1, 512>}, {transform_indices = @transform_3, window_bounds = array<i64: 1, 1, 16, 512>}]} {
    %c0 = arith.constant 0 : index
    %c0_0 = arith.constant 0 : index
    %c0_1 = arith.constant 0 : index
    %c0_2 = arith.constant 0 : index
    %0 = vector.load %arg2[%c0, %c0_0, %c0_1, %c0_2] : memref<1x1x18x72xbf16, #tpu.memory_space<vmem>>, vector<1x1x16x72xbf16>
    %1 = vector.shape_cast %0 : vector<1x1x16x72xbf16> to vector<16x72xbf16>
    %c0_3 = arith.constant 0 : index
    %c0_4 = arith.constant 0 : index
    %c0_5 = arith.constant 0 : index
    %2 = vector.load %arg3[%c0_3, %c0_4, %c0_5] : memref<3x72x512xbf16, #tpu.memory_space<vmem>>, vector<1x72x512xbf16>
    %3 = vector.shape_cast %2 : vector<1x72x512xbf16> to vector<72x512xbf16>
    %cst = arith.constant dense<0.000000e+00> : vector<16x512xf32>
    %4 = tpu.matmul %1, %3, %cst {dimension_numbers = #tpu.dot_dimension_numbers<[1], [0], [0], [1], [0, 0, 1, 1], [], []>} : vector<16x72xbf16>, vector<72x512xbf16>, vector<16x512xf32> -> vector<16x512xf32>
    %c0_6 = arith.constant 0 : index
    %c0_7 = arith.constant 0 : index
    %c1 = arith.constant 1 : index
    %c0_8 = arith.constant 0 : index
    %5 = vector.load %arg2[%c0_6, %c0_7, %c1, %c0_8] : memref<1x1x18x72xbf16, #tpu.memory_space<vmem>>, vector<1x1x16x72xbf16>
    %6 = vector.shape_cast %5 : vector<1x1x16x72xbf16> to vector<16x72xbf16>
    %c1_9 = arith.constant 1 : index
    %c0_10 = arith.constant 0 : index
    %c0_11 = arith.constant 0 : index
    %7 = vector.load %arg3[%c1_9, %c0_10, %c0_11] : memref<3x72x512xbf16, #tpu.memory_space<vmem>>, vector<1x72x512xbf16>
    %8 = vector.shape_cast %7 : vector<1x72x512xbf16> to vector<72x512xbf16>
    %cst_12 = arith.constant dense<0.000000e+00> : vector<16x512xf32>
    %9 = tpu.matmul %6, %8, %cst_12 {dimension_numbers = #tpu.dot_dimension_numbers<[1], [0], [0], [1], [0, 0, 1, 1], [], []>} : vector<16x72xbf16>, vector<72x512xbf16>, vector<16x512xf32> -> vector<16x512xf32>
    %10 = arith.addf %4, %9 : vector<16x512xf32>
    %c0_13 = arith.constant 0 : index
    %c0_14 = arith.constant 0 : index
    %c2 = arith.constant 2 : index
    %c0_15 = arith.constant 0 : index
    %11 = vector.load %arg2[%c0_13, %c0_14, %c2, %c0_15] : memref<1x1x18x72xbf16, #tpu.memory_space<vmem>>, vector<1x1x16x72xbf16>
    %12 = vector.shape_cast %11 : vector<1x1x16x72xbf16> to vector<16x72xbf16>
    %c2_16 = arith.constant 2 : index
    %c0_17 = arith.constant 0 : index
    %c0_18 = arith.constant 0 : index
    %13 = vector.load %arg3[%c2_16, %c0_17, %c0_18] : memref<3x72x512xbf16, #tpu.memory_space<vmem>>, vector<1x72x512xbf16>
    %14 = vector.shape_cast %13 : vector<1x72x512xbf16> to vector<72x512xbf16>
    %cst_19 = arith.constant dense<0.000000e+00> : vector<16x512xf32>
    %15 = tpu.matmul %12, %14, %cst_19 {dimension_numbers = #tpu.dot_dimension_numbers<[1], [0], [0], [1], [0, 0, 1, 1], [], []>} : vector<16x72xbf16>, vector<72x512xbf16>, vector<16x512xf32> -> vector<16x512xf32>
    %16 = arith.addf %10, %15 : vector<16x512xf32>
    %c0_20 = arith.constant 0 : index
    %c0_21 = arith.constant 0 : index
    %17 = vector.load %arg4[%c0_20, %c0_21] : memref<1x512xf32, #tpu.memory_space<vmem>>, vector<1x512xf32>
    %18 = vector.broadcast %17 : vector<1x512xf32> to vector<16x512xf32>
    %19 = arith.addf %16, %18 : vector<16x512xf32>
    %cst_22 = arith.constant 0.000000e+00 : f32
    %20 = vector.broadcast %cst_22 : f32 to vector<16x512xf32>
    %21 = arith.maximumf %19, %20 : vector<16x512xf32>
    %c0_23 = arith.constant 0 : index
    %c0_24 = arith.constant 0 : index
    %c0_25 = arith.constant 0 : index
    %c0_26 = arith.constant 0 : index
    %22 = vector.load %arg5[%c0_23, %c0_24, %c0_25, %c0_26] : memref<1x1x16x512xf32, #tpu.memory_space<vmem>>, vector<1x1x16x512xf32>
    %23 = vector.shape_cast %22 : vector<1x1x16x512xf32> to vector<16x512xf32>
    %24 = vector.shape_cast %21 : vector<16x512xf32> to vector<1x1x16x512xf32>
    tpu.vector_store %arg5[%c0_23, %c0_24, %c0_25, %c0_26], %24 {strides = array<i32>} : memref<1x1x16x512xf32, #tpu.memory_space<vmem>>, vector<1x1x16x512xf32>,
    return
  }
  func.func @transform_0(%arg0: i32, %arg1: i32) -> (i32, i32, i32, i32) {
    %c0_i32 = arith.constant 0 : i32
    %c0_i32_0 = arith.constant 0 : i32
    %c0_i32_1 = arith.constant 0 : i32
    return %arg0, %arg1, %c0_i32, %c0_i32_0 : i32, i32, i32, i32
  }
  func.func @transform_1(%arg0: i32, %arg1: i32) -> (i32, i32, i32) {
    %c0_i32 = arith.constant 0 : i32
    %c0_i32_0 = arith.constant 0 : i32
    %c0_i32_1 = arith.constant 0 : i32
    %c0_i32_2 = arith.constant 0 : i32
    return %c0_i32, %c0_i32_0, %c0_i32_1 : i32, i32, i32
  }
  func.func @transform_2(%arg0: i32, %arg1: i32) -> (i32, i32) {
    %c0_i32 = arith.constant 0 : i32
    %c0_i32_0 = arith.constant 0 : i32
    %c0_i32_1 = arith.constant 0 : i32
    return %c0_i32, %c0_i32_0 : i32, i32
  }
  func.func @transform_3(%arg0: i32, %arg1: i32) -> (i32, i32, i32, i32) {
    %c0_i32 = arith.constant 0 : i32
    %c0_i32_0 = arith.constant 0 : i32
    %c0_i32_1 = arith.constant 0 : i32
    return %arg0, %arg1, %c0_i32, %c0_i32_0 : i32, i32, i32, i32
  }
}

</mosaic_0001>

<bundles_post_ra>
// kernel: tpu_custom_call.1
= control target key start
LH: loop header
LB: loop body
LE: loop exit
PB: predicated region body
PF: predicated region fallthrough
CT: control target
= control target key end

     0   :  { %8 = vsyncpa [#allocation3], 0  ;;  %s1589_s0 = inlined_call_operand.vmem [shape: bf16[2,1,18,72], index: 0, kind: input, shape index: {}]   ;;  %s1590_s1 = inlined_call_operand.hbm [shape: bf16[3,72,512], index: 1, kind: input, shape index: {}]   ;;  %s1591_s2 = inlined_call_operand.vmem [shape: f32[1,512], index: 2, kind: input, shape index: {}]   ;;  %s1592_s3 = inlined_call_operand.hbm [shape: f32[2,1,16,512], index: 3, kind: output, shape index: {}]  }
   0x1   :  { %9 = vsyncpa [#allocation4], 0 }
   0x2   :  { %11 = vsyncpa [#allocation4 + $0x1], 0  ;;  %s1425_s12 = smov 0   ;;  %s1427_s13 = smov 0  }
   0x3   :  { %s1429_s14 = smov 0   ;;  %s1431_s15 = smov 0  }
   0x4   :  { %s1433_s16 = smov 0   ;;  %s1435_s17 = smov 0  }
   0x5 LB: > { %s941_s18 = sadd.s32 4294967295, %s1398_s17   ;;  %s942_s19 = sadd.s32 4294967294, %s1398_s17   ;;  %s1398_s17 = sphi %s1435_s17, %s17_s17   ;;  %s1394_s16 = sphi %s1433_s16, %s1599_s16   ;;  %s1390_s15 = sphi %s1431_s15, %s1598_s15   ;;  %s1386_s14 = sphi %s1429_s14, %s1597_s14   ;;  %s1382_s13 = sphi %s1427_s13, %s1596_s13   ;;  %s1378_s12 = sphi %s1425_s12, %s1595_s12  }
   0x6   : > { %s29_s20 = sadd.s32 1, %s1394_s16  ;;  %s108_s21 = sadd.s32 1, %s1386_s14 }
   0x7   : > { %p31_p0 = scmp.ge.s32.totalorder %s29_s20, 2  ;;  %p118_p1 = scmp.ne.s32.totalorder %s1386_s14, %s1382_s13 }
   0x8   : > { %p119_p2 = scmp.eq.s32.totalorder %s941_s18, 1  ;;  %p124_p3 = scmp.ne.s32.totalorder %s1382_s13, %s1378_s12 }
   0x9   : > { %s1601_s20 = smov (%p31_p0, %s29_s20), 0  ;;  %p125_p5 = scmp.eq.s32.totalorder %s942_s19, 1 }
   0xa   : > { %p1465_p4 = por %p119_p2, %p118_p1  ;;  %s103_s23 = ssub.s32 %s1394_s16, %s1601_s20 }
   0xb   : > { %p943_p6 = scmp.ge.s32.totalorder %s1398_s17, 1  ;;  %p106_p7 = scmp.eq.s32.totalorder %s103_s23, 0 }
   0xc   : > { %p1472_p8 = por %p125_p5, %p124_p3  ;;  %p132_p9 = scmp.lt.s32.totalorder %s1398_s17, 3 }
   0xd   : > { %s1478_s25 = scalar_select %p106_p7, %s1386_s14, %s108_s21  }
   0xe   : > { %p133_p10 = pnand %p943_p6, %p132_p9  ;;  %p1230_p11 = scmp.eq.s32.totalorder %s941_s18, 0 }
   0xf   : > { %s143_s28 = sshll.u32 %s1590_s1, 4  ;;  %s1400_s29 = smov [#allocation2]   ;;  %s144_s28 = int_to_ptr.hbm [resolvable:$true] %s143_s28 }
  0x10   : > { %p1222_p12 = pneg %p133_p10  ;;  %s145_s30 = sshll.u32 %s1400_s29, 4  ;;  %s146_s30 = int_to_ptr.vmem [resolvable:$true] %s145_s30 }
  0x11   : > { %s1401_s4 = smov 256   ;;  %s1402_s5 = smov 16  }
  0x12   : > { %p1223_p13 = pnand %p1230_p11, %p1222_p12  ;;  %176 = sbr.rel (%p133_p10) target bundleno = 241 (0xf1), region = 32 }
  0x14   : > { %1225 = dma.hbm_to_vmem [thread:$0]  (!%p1223_p13), %s144_s28, 6912, %s146_s30, [#allocation3], %s1401_s4, %s1401_s4, %s1402_s5  }
  0x17   : > { %1369 = dma.done.wait (%p1230_p11), [#allocation3], 6912  }
  0x18   : > { %1371 = vsyncadd (%p1230_p11), [#allocation3], 4294960384  ;;  %p205_p0 = scmp.lt.s32.totalorder %s1390_s15, 1  ;;  %v253_v0 = vld [vmem:[#allocation2 + $0x110] sm:$0xff]  ;;  %v254_v1 = vld [vmem:[#allocation2 + $0x118] sm:$0xff]  ;;  %vm370_vm0 = vcmask 1043456  }
  0x19   : > { %v326_v2 = vunpack.c.l.b16 %v253_v0  ;;  %v327_v3 = vunpack.c.h.b16 %v253_v0  ;;  %v328_v4 = vunpack.c.l.b16 %v254_v1  ;;  %v329_v5 = vunpack.c.h.b16 %v254_v1  ;;  %v1000_v6 = vld [vmem:[#allocation2 + $0xf0] sm:$0xf]  ;;  %v1189_v7 = vld [vmem:[#allocation2 + $0xfc] sm:$0xf0]  ;;  %v1187_v12 = vld [vmem:[#allocation2 + $0xf4] sm:$0xf] }
  0x1a   : > { %s1485_s6 = scalar_select %p205_p0, %s1390_s15, 1  ;;  %v1002_v13 = vld [vmem:[#allocation2 + $0x100] sm:$0xf0]  ;;  %v1008_v14 = vld [vmem:[#allocation2 + $0xf8] sm:$0xf]  ;;  %v1001_v22 = vor.u32 %v1189_v7, %v1000_v6  ;;  %v234_v47 = vld [vmem:[#allocation2 + $0x88] sm:$0xff] }
  0x1b   : > { %v346_v8 = vpack.c.b16 %v326_v2, %v326_v2  ;;  %v347_v9 = vpack.c.b16 %v327_v3, %v327_v3  ;;  %v348_v10 = vpack.c.b16 %v328_v4, %v328_v4  ;;  %v349_v11 = vpack.c.b16 %v329_v5, %v329_v5  ;;  %v1190_v15 = vld [vmem:[#allocation2 + $0x104] sm:$0xf0]  ;;  %v1188_v16 = vld [vmem:[#allocation2 + $0xfc] sm:$0xf]  ;;  %v1010_v17 = vld [vmem:[#allocation2 + $0x108] sm:$0xf0] }
  0x1c   : > { %v1005_v23 = vor.u32 %v1187_v12, %v1002_v13  ;;  %v984_v24 = vld [vmem:[#allocation2 + $0xd0] sm:$0xf]  ;;  %v1185_v25 = vld [vmem:[#allocation2 + $0xdc] sm:$0xf0]  ;;  %s1215_s7 = smul.u32 12, %s1485_s6  ;;  %v1009_v26 = vor.u32 %v1190_v15, %v1008_v14  ;;  %v1013_v27 = vor.u32 %v1188_v16, %v1010_v17  ;;  %v491_v58 = vunpack.c.l.b16 %v234_v47  ;;  %s202_s19 = sand.u32 1, %s1382_s13  }
  0x1d   : > { %v372_v18 = vsel %vm370_vm0, %v346_v8, 0  ;;  %v375_v19 = vsel %vm370_vm0, %v347_v9, 0  ;;  %v378_v20 = vsel %vm370_vm0, %v348_v10, 0  ;;  %v381_v21 = vsel %vm370_vm0, %v349_v11, 0  ;;  %v1183_v28 = vld [vmem:[#allocation2 + $0xd4] sm:$0xf] }
  0x1e   : > { %386 = vmatpush.bf16.msra.mxu0 %v372_v18  ;;  %400 = vmatpush.bf16.msra.mxu1 %v375_v19  ;;  %v986_v29 = vld [vmem:[#allocation2 + $0xe0] sm:$0xf0]  ;;  %v992_v30 = vld [vmem:[#allocation2 + $0xd8] sm:$0xf]  ;;  %v1186_v31 = vld [vmem:[#allocation2 + $0xe4] sm:$0xf0]  ;;  %v985_v36 = vor.u32 %v1185_v25, %v984_v24  ;;  %s1495_s10 = scalar_lea.vmem %s1589_s0, %s1215_s7  ;;  %v492_v59 = vunpack.c.h.b16 %v234_v47  ;;  %v511_v11 = vpack.c.b16 %v491_v58, %v491_v58 }
  0x1f   : > { %414 = vmatpush.bf16.msra.mxu2 %v378_v20  ;;  %428 = vmatpush.bf16.msra.mxu3 %v381_v21  ;;  %v1184_v32 = vld [vmem:[#allocation2 + $0xdc] sm:$0xf]  ;;  %v994_v33 = vld [vmem:[#allocation2 + $0xe8] sm:$0xf0]  ;;  %v968_v34 = vld [vmem:[#allocation2 + $0xb0] sm:$0xf]  ;;  %v989_v37 = vor.u32 %v1183_v28, %v986_v29  ;;  %v993_v41 = vor.u32 %v1186_v31, %v992_v30 }
  0x20   : > { %v1181_v35 = vld [vmem:[#allocation2 + $0xbc] sm:$0xf0]  ;;  %v1179_v38 = vld [vmem:[#allocation2 + $0xb4] sm:$0xf]  ;;  %v970_v39 = vld [vmem:[#allocation2 + $0xc0] sm:$0xf0]  ;;  %v997_v42 = vor.u32 %v1184_v32, %v994_v33  ;;  %v512_v12 = vpack.c.b16 %v492_v59, %v492_v59 }
  0x21   : > { %v976_v40 = vld [vmem:[#allocation2 + $0xb8] sm:$0xf]  ;;  %v1182_v43 = vld [vmem:[#allocation2 + $0xc4] sm:$0xf0]  ;;  %v1180_v44 = vld [vmem:[#allocation2 + $0xbc] sm:$0xf]  ;;  %v969_v49 = vor.u32 %v1181_v35, %v968_v34  ;;  %v973_v50 = vor.u32 %v1179_v38, %v970_v39 }
  0x22   : > { %387 = vmatpush.bf16.msra.mxu0 %v1001_v22  ;;  %401 = vmatpush.bf16.msra.mxu1 %v1005_v23  ;;  %v978_v45 = vld [vmem:[#allocation2 + $0xc8] sm:$0xf0]  ;;  %v233_v46 = vld [vmem:[#allocation2 + $0x80] sm:$0xff]  ;;  %v952_v51 = vld [vmem:[#allocation2 + $0x90] sm:$0xf]  ;;  %v977_v62 = vor.u32 %v1182_v43, %v976_v40  ;;  %vm366_vm2 = vcmask 588800  }
  0x23   : > { %415 = vmatpush.bf16.msra.mxu2 %v1009_v26  ;;  %429 = vmatpush.bf16.msra.mxu3 %v1013_v27  ;;  %v1498_v48 = vld [vmem:[%s1495_s10] sm:$0xff]   ;;  %v489_v53 = vunpack.c.l.b16 %v233_v46  ;;  %v490_v54 = vunpack.c.h.b16 %v233_v46  ;;  %v235_v55 = vld [vmem:[%s1495_s10 + $0x8] sm:$0x1]  ;;  %v1175_v56 = vld [vmem:[#allocation2 + $0x94] sm:$0xf]  ;;  %v981_v63 = vor.u32 %v1180_v44, %v978_v45  ;;  %v538_v26 = vsel %vm370_vm0, %v511_v11, 0 }
  0x24   : > { %v1177_v52 = vld [vmem:[#allocation2 + $0x9c] sm:$0xf0]  ;;  %v954_v57 = vld [vmem:[#allocation2 + $0xa0] sm:$0xf0]  ;;  %v260_v60 = vunpack.c.l.b16 %v235_v55  ;;  %v267_v61 = vshll.u32 %v1498_v48, 16  ;;  %v265_v2 = vshrl.u32 %v1498_v48, 16 }
  0x25   : > { %v960_v0 = vld [vmem:[#allocation2 + $0x98] sm:$0xf]  ;;  %v1178_v1 = vld [vmem:[#allocation2 + $0xa4] sm:$0xf0]  ;;  %v1176_v3 = vld [vmem:[#allocation2 + $0x9c] sm:$0xf]  ;;  %v953_v7 = vor.u32 %v1177_v52, %v952_v51  ;;  %v509_v8 = vpack.c.b16 %v489_v53, %v489_v53  ;;  %v510_v9 = vpack.c.b16 %v490_v54, %v490_v54  ;;  %v957_v10 = vor.u32 %v1175_v56, %v954_v57 }
  0x26   : > { %388 = vmatpush.bf16.msra.mxu0 %v985_v36  ;;  %402 = vmatpush.bf16.msra.mxu1 %v989_v37  ;;  %v962_v4 = vld [vmem:[#allocation2 + $0xa8] sm:$0xf0]  ;;  %v1503_v5 = vpack.c.b16 %v260_v60, %v260_v60  ;;  %v269_v6 = vrot.slane %v267_v61, 1  ;;  %v961_v14 = vor.u32 %v1178_v1, %v960_v0  ;;  %vm263_vm1 = vsmask.f32 7424  ;;  %v617_v35 = vld [vmem:[#allocation2 + $0x1a0] sm:$0xff] }
  0x27   : > { %416 = vmatpush.bf16.msra.mxu2 %v993_v41  ;;  %430 = vmatpush.bf16.msra.mxu3 %v997_v42  ;;  %v965_v15 = vor.u32 %v1176_v3, %v962_v4  ;;  %v1068_v17 = vld [vmem:[#allocation2 + $0x60] sm:$0xf]  ;;  %v1173_v18 = vld [vmem:[#allocation2 + $0x6c] sm:$0xf0]  ;;  %v1171_v20 = vld [vmem:[#allocation2 + $0x64] sm:$0xf]  ;;  %v677_v56 = vunpack.c.h.b16 %v617_v35 }
  0x28   : > { %v272_v13 = vshll.u32 %v1503_v5, 16  ;;  %v270_v16 = vor.u32 %v269_v6, %v265_v2  ;;  %v1070_v21 = vld [vmem:[#allocation2 + $0x70] sm:$0xf0]  ;;  %v532_v22 = vsel %vm370_vm0, %v509_v8, 0  ;;  %v535_v23 = vsel %vm370_vm0, %v510_v9, 0  ;;  %v618_v44 = vld [vmem:[#allocation2 + $0x1a8] sm:$0xff] }
  0x29   : > { %v1076_v24 = vld [vmem:[#allocation2 + $0x68] sm:$0xf]  ;;  %v1174_v25 = vld [vmem:[#allocation2 + $0x74] sm:$0xf0]  ;;  %v541_v27 = vsel %vm370_vm0, %v512_v12, 0  ;;  %v1069_v31 = vor.u32 %v1173_v18, %v1068_v17  ;;  %v1073_v32 = vor.u32 %v1171_v20, %v1070_v21  ;;  %v678_v60 = vunpack.c.l.b16 %v618_v44  ;;  %s948_s21 = sshll.u32 %s202_s19, 6 }
  0x2a   : > { %389 = vmatpush.bf16.msra.mxu0 %v969_v49  ;;  %403 = vmatpush.bf16.msra.mxu1 %v973_v50  ;;  %v274_v19 = vrot.slane %v272_v13, 1  ;;  %v1172_v28 = vld [vmem:[#allocation2 + $0x6c] sm:$0xf]  ;;  %v1078_v29 = vld [vmem:[#allocation2 + $0x78] sm:$0xf0]  ;;  %v1077_v36 = vor.u32 %v1174_v25, %v1076_v24  ;;  %v676_v50 = vunpack.c.l.b16 %v617_v35  ;;  %v679_v61 = vunpack.c.h.b16 %v618_v44  ;;  %s1540_s23 = scalar_lea.vmem [#allocation5], %s948_s21 }
  0x2b   : > { %417 = vmatpush.bf16.msra.mxu2 %v977_v62  ;;  %431 = vmatpush.bf16.msra.mxu3 %v981_v63  ;;  %v1052_v33 = vld [vmem:[#allocation2 + $0x40] sm:$0xf]  ;;  %v1169_v34 = vld [vmem:[#allocation2 + $0x4c] sm:$0xf0]  ;;  %v1081_v37 = vor.u32 %v1172_v28, %v1078_v29  ;;  %v1167_v38 = vld [vmem:[#allocation2 + $0x44] sm:$0xf]  ;;  %v697_v9 = vpack.c.b16 %v677_v56, %v677_v56  ;;  %v698_v13 = vpack.c.b16 %v678_v60, %v678_v60 }
  0x2c   : > { %v275_v30 = vsel %vm263_vm1, %v270_v16, %v274_v19  ;;  %v1054_v39 = vld [vmem:[#allocation2 + $0x50] sm:$0xf0]  ;;  %v1060_v40 = vld [vmem:[#allocation2 + $0x48] sm:$0xf]  ;;  %v1170_v41 = vld [vmem:[#allocation2 + $0x54] sm:$0xf0]  ;;  %v1053_v45 = vor.u32 %v1169_v34, %v1052_v33  ;;  %v696_v2 = vpack.c.b16 %v676_v50, %v676_v50 }
  0x2d   : > { %v1168_v42 = vld [vmem:[#allocation2 + $0x4c] sm:$0xf]  ;;  %v1062_v43 = vld [vmem:[#allocation2 + $0x58] sm:$0xf0]  ;;  %v1057_v46 = vor.u32 %v1167_v38, %v1054_v39  ;;  %v1036_v47 = vld [vmem:[#allocation2 + $0x20] sm:$0xf]  ;;  %v1061_v51 = vor.u32 %v1170_v41, %v1060_v40 }
  0x2e   : > { %390 = vmatpush.bf16.msra.mxu0 %v953_v7  ;;  %404 = vmatpush.bf16.msra.mxu1 %v957_v10  ;;  %v1165_v49 = vld [vmem:[#allocation2 + $0x2c] sm:$0xf0]  ;;  %v1065_v52 = vor.u32 %v1168_v42, %v1062_v43  ;;  %v1163_v53 = vld [vmem:[#allocation2 + $0x24] sm:$0xf]  ;;  %v1038_v54 = vld [vmem:[#allocation2 + $0x30] sm:$0xf0] }
  0x2f   : > { %418 = vmatpush.bf16.msra.mxu2 %v961_v14  ;;  %432 = vmatpush.bf16.msra.mxu3 %v965_v15  ;;  %v1044_v55 = vld [vmem:[#allocation2 + $0x28] sm:$0xf]  ;;  %v1166_v57 = vld [vmem:[#allocation2 + $0x34] sm:$0xf0]  ;;  %v1164_v58 = vld [vmem:[#allocation2 + $0x2c] sm:$0xf]  ;;  %v1037_v62 = vor.u32 %v1165_v49, %v1036_v47  ;;  %v1041_v63 = vor.u32 %v1163_v53, %v1038_v54  ;;  %v699_v14 = vpack.c.b16 %v679_v61, %v679_v61 }
  0x30   : > { %v1046_v59 = vld [vmem:[#allocation2 + $0x38] sm:$0xf0]  ;;  %v1020_v0 = vld [vmem:[#allocation2] sm:$0xf]  ;;  %v1161_v1 = vld [vmem:[#allocation2 + $0xc] sm:$0xf0]  ;;  %v1045_v3 = vor.u32 %v1166_v57, %v1044_v55 }
  0x31   : > { %1014 = vmatmul.msk.bf16.vlgmr.msra.gmra.mxu0 %vm366_vm2, %v275_v30  ;;  %1015 = vmatmul.msk.bf16.vlgmr.msra.gmra.mxu1 %vm366_vm2, %v275_v30  ;;  %v1049_v4 = vor.u32 %v1164_v58, %v1046_v59  ;;  %v1159_v6 = vld [vmem:[#allocation2 + $0x4] sm:$0xf]  ;;  %v1022_v7 = vld [vmem:[#allocation2 + $0x10] sm:$0xf0]  ;;  %v1028_v8 = vld [vmem:[#allocation2 + $0x8] sm:$0xf]  ;;  %v1021_v15 = vor.u32 %v1161_v1, %v1020_v0 }
  0x32   : > { %546 = vmatpush.bf16.msrb.mxu0 %v532_v22  ;;  %560 = vmatpush.bf16.msrb.mxu1 %v535_v23  ;;  %v1162_v10 = vld [vmem:[#allocation2 + $0x14] sm:$0xf0]  ;;  %v1160_v11 = vld [vmem:[#allocation2 + $0xc] sm:$0xf]  ;;  %v1030_v12 = vld [vmem:[#allocation2 + $0x18] sm:$0xf0]  ;;  %v1025_v16 = vor.u32 %v1159_v6, %v1022_v7 }
  0x33   : > { %574 = vmatpush.bf16.msrb.mxu2 %v538_v26  ;;  %588 = vmatpush.bf16.msrb.mxu3 %v541_v27  ;;  %v1029_v17 = vor.u32 %v1162_v10, %v1028_v8  ;;  %v1033_v18 = vor.u32 %v1160_v11, %v1030_v12  ;;  %v720_v19 = vsel %vm370_vm0, %v696_v2, 0  ;;  %v723_v20 = vsel %vm370_vm0, %v697_v9, 0  ;;  %v1136_v23 = vld [vmem:[#allocation2 + $0x180] sm:$0xf]  ;;  %v1205_v24 = vld [vmem:[#allocation2 + $0x18c] sm:$0xf0] }
  0x34   : > { %1016 = vmatmul.msk.bf16.vlgmr.msra.gmra.mxu2 %vm366_vm2, %v275_v30  ;;  %1017 = vmatmul.msk.bf16.vlgmr.msra.gmra.mxu3 %vm366_vm2, %v275_v30  ;;  %v726_v21 = vsel %vm370_vm0, %v698_v13, 0  ;;  %v729_v22 = vsel %vm370_vm0, %v699_v14, 0  ;;  %v1203_v25 = vld [vmem:[#allocation2 + $0x184] sm:$0xf]  ;;  %v1138_v26 = vld [vmem:[#allocation2 + $0x190] sm:$0xf0] }
  0x35   : > { %v1144_v27 = vld [vmem:[#allocation2 + $0x188] sm:$0xf]  ;;  %v1206_v28 = vld [vmem:[#allocation2 + $0x194] sm:$0xf0]  ;;  %v1204_v29 = vld [vmem:[#allocation2 + $0x18c] sm:$0xf] }
  0x36   : > { %547 = vmatpush.bf16.msrb.mxu0 %v1069_v31  ;;  %561 = vmatpush.bf16.msrb.mxu1 %v1073_v32  ;;  %v1146_v30 = vld [vmem:[#allocation2 + $0x198] sm:$0xf0]  ;;  %v1137_v31 = vor.u32 %v1205_v24, %v1136_v23  ;;  %v1141_v32 = vor.u32 %v1203_v25, %v1138_v26  ;;  %v1120_v33 = vld [vmem:[#allocation2 + $0x160] sm:$0xf]  ;;  %v1201_v34 = vld [vmem:[#allocation2 + $0x16c] sm:$0xf0]  ;;  %v1145_v35 = vor.u32 %v1206_v28, %v1144_v27 }
  0x37   : > { %575 = vmatpush.bf16.msrb.mxu2 %v1077_v36  ;;  %589 = vmatpush.bf16.msrb.mxu3 %v1081_v37  ;;  %v1149_v36 = vor.u32 %v1204_v29, %v1146_v30  ;;  %v1199_v37 = vld [vmem:[#allocation2 + $0x164] sm:$0xf]  ;;  %v1122_v38 = vld [vmem:[#allocation2 + $0x170] sm:$0xf0]  ;;  %v1128_v39 = vld [vmem:[#allocation2 + $0x168] sm:$0xf]  ;;  %v1121_v44 = vor.u32 %v1201_v34, %v1120_v33 }
  0x38   : > { %v1202_v40 = vld [vmem:[#allocation2 + $0x174] sm:$0xf0]  ;;  %v1200_v41 = vld [vmem:[#allocation2 + $0x16c] sm:$0xf]  ;;  %v1130_v42 = vld [vmem:[#allocation2 + $0x178] sm:$0xf0] }
  0x39   : > { %v1104_v43 = vld [vmem:[#allocation2 + $0x140] sm:$0xf]  ;;  %v1195_v47 = vld [vmem:[#allocation2 + $0x144] sm:$0xf]  ;;  %v1106_v49 = vld [vmem:[#allocation2 + $0x150] sm:$0xf0]  ;;  %v1129_v50 = vor.u32 %v1202_v40, %v1128_v39 }
  0x3a   : > { %548 = vmatpush.bf16.msrb.mxu0 %v1053_v45  ;;  %562 = vmatpush.bf16.msrb.mxu1 %v1057_v46  ;;  %v1125_v45 = vor.u32 %v1199_v37, %v1122_v38  ;;  %v1197_v46 = vld [vmem:[#allocation2 + $0x14c] sm:$0xf0]  ;;  %v1212_v53 = vld [vmem:[%s1495_s10] sm:$0xf0]  ;;  %v1213_v54 = vld [vmem:[%s1495_s10] sm:$0xe]  ;;  %v1109_v58 = vor.u32 %v1195_v47, %v1106_v49 }
  0x3b   : > { %576 = vmatpush.bf16.msrb.mxu2 %v1061_v51  ;;  %590 = vmatpush.bf16.msrb.mxu3 %v1065_v52  ;;  %v1133_v51 = vor.u32 %v1200_v41, %v1130_v42  ;;  %v1112_v52 = vld [vmem:[#allocation2 + $0x148] sm:$0xf]  ;;  %v1198_v55 = vld [vmem:[#allocation2 + $0x154] sm:$0xf0]  ;;  %v1196_v56 = vld [vmem:[#allocation2 + $0x14c] sm:$0xf]  ;;  %v1214_v61 = vor.u32 %v1213_v54, %v1212_v53 }
  0x3c   : > { %v1114_v57 = vld [vmem:[#allocation2 + $0x158] sm:$0xf0]  ;;  %v1088_v59 = vld [vmem:[#allocation2 + $0x120] sm:$0xf]  ;;  %v1193_v60 = vld [vmem:[#allocation2 + $0x12c] sm:$0xf0] }
  0x3d   : > { %v1191_v0 = vld [vmem:[#allocation2 + $0x124] sm:$0xf]  ;;  %v1090_v1 = vld [vmem:[#allocation2 + $0x130] sm:$0xf0]  ;;  %v1096_v2 = vld [vmem:[#allocation2 + $0x128] sm:$0xf]  ;;  %v1089_v7 = vor.u32 %v1193_v60, %v1088_v59 }
  0x3e   : > { %549 = vmatpush.bf16.msrb.mxu0 %v1037_v62  ;;  %563 = vmatpush.bf16.msrb.mxu1 %v1041_v63  ;;  %v1113_v62 = vor.u32 %v1198_v55, %v1112_v52  ;;  %v1117_v63 = vor.u32 %v1196_v56, %v1114_v57  ;;  %v1098_v6 = vld [vmem:[#allocation2 + $0x138] sm:$0xf0]  ;;  %v1093_v8 = vor.u32 %v1191_v0, %v1090_v1  ;;  %v623_v9 = vrot.slane %v1214_v61, 1  ;;  %v795_v27 = vld [vmem:[%s1591_s2] sm:$0xf]  ;;  %s1207_s26 = sshll.u32 %s1390_s15, 6 }
  0x3f   : > { %577 = vmatpush.bf16.msrb.mxu2 %v1045_v3  ;;  %591 = vmatpush.bf16.msrb.mxu3 %v1049_v4  ;;  %v1194_v3 = vld [vmem:[#allocation2 + $0x134] sm:$0xf0]  ;;  %v1192_v4 = vld [vmem:[#allocation2 + $0x12c] sm:$0xf]  ;;  %v624_v10 = vrot.slane %v1503_v5, 1  ;;  %vm622_vm3 = vcmask 1046528   ;;  %s843_s29 = scalar_lea.hbm %s1592_s3, %s1207_s26 }
  0x40   : > { %v1097_v11 = vor.u32 %v1194_v3, %v1096_v2  ;;  %v1101_v12 = vor.u32 %v1192_v4, %v1098_v6  ;;  %v798_v33 = vperm.slane %v795_v27, 1  ;;  %s844_s15 = sshll.u32 %s1540_s23, 4  ;;  %s846_s30 = sshll.u32 %s843_s29, 4  ;;  %s845_s15 = int_to_ptr.vmem [resolvable:$true] %s844_s15  ;;  %s847_s30 = int_to_ptr.hbm [resolvable:$true] %s846_s30 }
  0x41   : > { %v625_v13 = vsel %vm622_vm3, %v623_v9, %v624_v10  ;;  %s830_s4 = scalar_lea.sflag [#allocation4], %s202_s19  ;;  %s1330_s5 = sshra.s32 %s847_s30, 4  ;;  %s1331_s5 = int_to_ptr.hbm [resolvable:$true] %s1330_s5 }
  0x42   : > { %550 = vmatpush.bf16.msrb.mxu0 %v1021_v15  ;;  %564 = vmatpush.bf16.msrb.mxu1 %v1025_v16  ;;  %s1332_s6 = scalar_lea.hbm %s1331_s5, 64  ;;  %s1336_s9 = scalar_lea.hbm %s1592_s3, 128 }
  0x43   : > { %578 = vmatpush.bf16.msrb.mxu2 %v1029_v17  ;;  %592 = vmatpush.bf16.msrb.mxu3 %v1033_v18  ;;  %p1333_p1 = scmp.ne.s32.totalorder %s1331_s5, %s1332_s6  ;;  %p1337_p5 = scmp.lt.s32.totalorder %s1331_s5, %s1592_s3 }
  0x44   : > { %p1338_p6 = scmp.lt.s32.totalorder %s1336_s9, %s1332_s6 }
  0x45   : > { %1082 = vmatmul.msk.bf16.vlgmr.msrb.gmra.mxu0 %vm366_vm2, %v1498_v48  ;;  %1083 = vmatmul.msk.bf16.vlgmr.msrb.gmra.mxu1 %vm366_vm2, %v1498_v48  ;;  %p1334_p2 = pnand %p1333_p1, %p1465_p4 }
  0x46   : > { %734 = vmatpush.bf16.msra.mxu0 %v720_v19  ;;  %748 = vmatpush.bf16.msra.mxu1 %v723_v20  ;;  %p1339_p7 = por %p1338_p6, %p1337_p5 }
  0x47   : > { %762 = vmatpush.bf16.msra.mxu2 %v726_v21  ;;  %776 = vmatpush.bf16.msra.mxu3 %v729_v22  ;;  %p1335_p3 = pneg %p1334_p2 }
  0x48   : > { %1084 = vmatmul.msk.bf16.vlgmr.msrb.gmra.mxu2 %vm366_vm2, %v1498_v48  ;;  %1085 = vmatmul.msk.bf16.vlgmr.msrb.gmra.mxu3 %vm366_vm2, %v1498_v48  ;;  %v1105_v48 = vor.u32 %v1197_v46, %v1104_v43 }
  0x49   : > { %p1340_p9 = pnand %p1339_p7, %p1335_p3 }
  0x4a   : > { %735 = vmatpush.bf16.msra.mxu0 %v1137_v31  ;;  %749 = vmatpush.bf16.msra.mxu1 %v1141_v32  ;;  %v797_v32 = vperm.slane %v795_v27, 0 }
  0x4b   : > { %763 = vmatpush.bf16.msra.mxu2 %v1145_v35  ;;  %777 = vmatpush.bf16.msra.mxu3 %v1149_v36 }
  0x4e   : > { %736 = vmatpush.bf16.msra.mxu0 %v1121_v44  ;;  %750 = vmatpush.bf16.msra.mxu1 %v1125_v45  ;;  %v799_v44 = vperm.slane %v795_v27, 2  ;;  %v800_v45 = vperm.slane %v795_v27, 3 }
  0x4f   : > { %764 = vmatpush.bf16.msra.mxu2 %v1129_v50  ;;  %778 = vmatpush.bf16.msra.mxu3 %v1133_v51 }
  0x52   : > { %737 = vmatpush.bf16.msra.mxu0 %v1105_v48  ;;  %751 = vmatpush.bf16.msra.mxu1 %v1109_v58 }
  0x53   : > { %765 = vmatpush.bf16.msra.mxu2 %v1113_v62  ;;  %779 = vmatpush.bf16.msra.mxu3 %v1117_v63 }
  0x56   : > { %738 = vmatpush.bf16.msra.mxu0 %v1089_v7  ;;  %752 = vmatpush.bf16.msra.mxu1 %v1093_v8 }
  0x57   : > { %766 = vmatpush.bf16.msra.mxu2 %v1097_v11  ;;  %780 = vmatpush.bf16.msra.mxu3 %v1101_v12 }
  0x59   : > { %1150 = vmatmul.msk.bf16.vlgmr.msra.gmra.mxu0 %vm366_vm2, %v625_v13  ;;  %1151 = vmatmul.msk.bf16.vlgmr.msra.gmra.mxu1 %vm366_vm2, %v625_v13 }
  0x5a   : > { %1152 = vmatmul.msk.bf16.vlgmr.msra.gmra.mxu2 %vm366_vm2, %v625_v13  ;;  %1153 = vmatmul.msk.bf16.vlgmr.msra.gmra.mxu3 %vm366_vm2, %v625_v13 }
  0xae   : > { %v392_v14 = vpop.f32.mrf.mxu0  ;;  %v406_v5 = vpop.f32.mrf.mxu1 }
  0xb6   : > { %v394_v17 = vpop.f32.mrf.mxu0  ;;  %v408_v18 = vpop.f32.mrf.mxu1 }
  0xb7   : > { %v420_v15 = vpop.f32.mrf.mxu2  ;;  %v434_v16 = vpop.f32.mrf.mxu3 }
  0xbf   : > { %v422_v19 = vpop.f32.mrf.mxu2  ;;  %v436_v20 = vpop.f32.mrf.mxu3 }
  0xc2   : > { %v552_v21 = vpop.f32.mrf.mxu0  ;;  %v566_v22 = vpop.f32.mrf.mxu1 }
  0xc3   : > { %v553_v30 = vadd.f32 %v552_v21, %v392_v14  ;;  %v567_v31 = vadd.f32 %v566_v22, %v406_v5 }
  0xca   : > { %v554_v25 = vpop.f32.mrf.mxu0  ;;  %v568_v26 = vpop.f32.mrf.mxu1 }
  0xcb   : > { %v580_v23 = vpop.f32.mrf.mxu2  ;;  %v594_v24 = vpop.f32.mrf.mxu3  ;;  %v555_v46 = vadd.f32 %v554_v25, %v394_v17  ;;  %v569_v47 = vadd.f32 %v568_v26, %v408_v18 }
  0xcc   : > { %v581_v42 = vadd.f32 %v580_v23, %v420_v15  ;;  %v595_v43 = vadd.f32 %v594_v24, %v434_v16 }
  0xd3   : > { %v582_v28 = vpop.f32.mrf.mxu2  ;;  %v596_v29 = vpop.f32.mrf.mxu3 }
  0xd4   : > { %v583_v0 = vadd.f32 %v582_v28, %v422_v19  ;;  %v597_v1 = vadd.f32 %v596_v29, %v436_v20 }
  0xd6   : > { %v740_v34 = vpop.f32.mrf.mxu0  ;;  %v754_v35 = vpop.f32.mrf.mxu1 }
  0xd7   : > { %v787_v36 = vadd.f32 %v740_v34, %v553_v30  ;;  %v788_v37 = vadd.f32 %v754_v35, %v567_v31 }
  0xd9   : > { %v805_v38 = vadd.f32 %v797_v32, %v787_v36  ;;  %v806_v39 = vadd.f32 %v798_v33, %v788_v37 }
  0xdb   : > { %v813_v40 = vmax.f32 %v805_v38, 0.0  ;;  %v814_v41 = vmax.f32 %v806_v39, 0.0 }
  0xdd   : > { %821 = vst [vmem:[%s1540_s23] sm:$0xff] %v813_v40  ;;  %v768_v49 = vpop.f32.mrf.mxu2  ;;  %v782_v50 = vpop.f32.mrf.mxu3 }
  0xde   : > { %822 = vst [vmem:[%s1540_s23 + $0x8] sm:$0xff] %v814_v41  ;;  %v789_v51 = vadd.f32 %v768_v49, %v581_v42  ;;  %v790_v52 = vadd.f32 %v782_v50, %v595_v43  ;;  %v742_v53 = vpop.f32.mrf.mxu0  ;;  %v756_v54 = vpop.f32.mrf.mxu1 }
  0xdf   : > { %v791_v55 = vadd.f32 %v742_v53, %v555_v46  ;;  %v792_v56 = vadd.f32 %v756_v54, %v569_v47 }
  0xe0   : > { %v807_v57 = vadd.f32 %v799_v44, %v789_v51  ;;  %v808_v48 = vadd.f32 %v800_v45, %v790_v52 }
  0xe1   : > { %v809_v58 = vadd.f32 %v797_v32, %v791_v55  ;;  %v810_v59 = vadd.f32 %v798_v33, %v792_v56 }
  0xe2   : > { %v815_v60 = vmax.f32 %v807_v57, 0.0  ;;  %v816_v61 = vmax.f32 %v808_v48, 0.0 }
  0xe3   : > { %v817_v62 = vmax.f32 %v809_v58, 0.0  ;;  %v818_v63 = vmax.f32 %v810_v59, 0.0 }
  0xe4   : > { %823 = vst [vmem:[%s1540_s23 + $0x10] sm:$0xff] %v815_v60 }
  0xe5   : > { %824 = vst [vmem:[%s1540_s23 + $0x18] sm:$0xff] %v816_v61  ;;  %v770_v2 = vpop.f32.mrf.mxu2  ;;  %v784_v3 = vpop.f32.mrf.mxu3 }
  0xe6   : > { %825 = vst [vmem:[%s1540_s23 + $0x20] sm:$0xff] %v817_v62  ;;  %v793_v4 = vadd.f32 %v770_v2, %v583_v0  ;;  %v794_v6 = vadd.f32 %v784_v3, %v597_v1 }
  0xe7   : > { %826 = vst [vmem:[%s1540_s23 + $0x28] sm:$0xff] %v818_v63 }
  0xe8   : > { %v811_v7 = vadd.f32 %v799_v44, %v793_v4  ;;  %v812_v8 = vadd.f32 %v800_v45, %v794_v6 }
  0xea   : > { %v819_v9 = vmax.f32 %v811_v7, 0.0  ;;  %v820_v10 = vmax.f32 %v812_v8, 0.0 }
  0xec   : > { %827 = vst [vmem:[%s1540_s23 + $0x30] sm:$0xff] %v819_v9 }
  0xed   : > { %828 = vst [vmem:[%s1540_s23 + $0x38] sm:$0xff] %v820_v10 }
  0xee   : > { %1343 = shalt.err (!%p1340_p9)
}
  0xef   : > { %s1403_s18 = smov 512   ;;  %s1404_s19 = smov 32  }
  0xf0   : > { %1220 = dma.vmem_to_hbm [thread:$0]  (%p1465_p4), %s845_s15, 1024, %s847_s30, %s830_s4, %s1403_s18, %s1403_s18, %s1404_s19  }
  0xf1 PF: > { %p1232_p10 = scmp.ge.s32.totalorder %s1398_s17, 2  ;;  %s861_s21 = sand.u32 1, %s1378_s12  }
  0xf2   : > { %s862_s23 = scalar_lea.sflag [#allocation4], %s861_s21 }
  0xf3   : > { %p1227_p11 = pnand %p1232_p10, %p1472_p8 }
  0xf5   : > { %p1228_p12 = pneg %p1227_p11 }
  0xf7   : > { %1373 = dma.done.wait (%p1228_p12), %s862_s23, 1024  }
  0xf8   : > { %1375 = vsyncadd (%p1228_p12), %s862_s23, 4294966272  ;;  %s17_s17 = sadd.s32 1, %s1398_s17   ;;  %s1595_s12 = smov %s1382_s13 }
  0xf9   : > { %p14_p13 = scmp.ge.s32.totalorder %s17_s17, 4   ;;  %s1596_s13 = smov %s1386_s14 }
  0xfa   : > { %s1597_s14 = smov %s1478_s25  ;;  %s1598_s15 = smov %s1394_s16 }
  0xfb   : > { %s1599_s16 = smov %s1601_s20  ;;  %16 = sbr.rel (!%p14_p13) target bundleno = 5 (0x5), region = 74 }
 0x100   :  { %868 = vsyncpa [#allocation3], 1 }
 0x101   :  { %870 = vsyncpa [#allocation3 + $0x1], 1 }
 0x102   :  { %871 = vsyncpa [#allocation4], 1 }
 0x103   :  { %873 = vsyncpa [#allocation4 + $0x1], 1 }

</bundles_post_ra>
